<compile_context>
chip_gen: v7x
topology: tpu7x:2x2x1
jax: 0.10.0
libtpu: 0.0.40
codegen_flags: <defaults>
</compile_context>

<pallas_src>
import functools

import jax
import jax.numpy as jnp
from jax.experimental import pallas as pl
from jax.experimental.pallas import tpu as pltpu


def _coord_att_kernel(x_ref, pool_ref, w1_ref, b1_ref, wh_ref, bh_ref,
                      ww_ref, bw_ref, eh_ref, ew_ref, o_ref, *, h, cc):
    """One batch element per grid step.

    x_ref  : (1, C, H*W)  input slab (native dtype, lane-dense)
    pool_ref: (H*W, H+W)  constant averaging matrix (cols 0..H-1 -> mean over W,
                          cols H..H+W-1 -> mean over H)
    w1_ref : (mip, C)     conv1 weight with BN folded in
    b1_ref : (mip, 1)     conv1 bias with BN folded in
    wh_ref : (C, mip), bh_ref: (C, 1)   conv_h weight / bias
    ww_ref : (C, mip), bw_ref: (C, 1)   conv_w weight / bias
    eh_ref : (H, H*W)     0/1 expansion: row h is 1 at flat positions h*W..h*W+W-1
    ew_ref : (W, H*W)     0/1 expansion: row w is 1 at flat positions {h*W+w}
    o_ref  : (1, C, H*W)  output slab
    """
    c = x_ref.shape[1]

    # ---- Stage 0: both pools in a single MXU matmul on the lane-dense slab.
    # pooled[:, :h] == mean over W (pool_h), pooled[:, h:] == mean over H (pool_w)
    pooled = jnp.dot(x_ref[0], pool_ref[...],
                     preferred_element_type=jnp.float32)            # (C, H+W)

    # ---- Stage 1: conv1 (BN pre-folded) + h_swish on the concatenated operand.
    y = jnp.dot(w1_ref[...], pooled,
                preferred_element_type=jnp.float32) + b1_ref[...]   # (mip, H+W)
    y = y * (jnp.clip(y + 3.0, 0.0, 6.0) * (1.0 / 6.0))             # h_swish
    yh = y[:, :h]                                                   # (mip, H)
    yw = y[:, h:]                                                   # (mip, W)

    # ---- Stages 2+3: per-channel-chunk gates + gated write.
    nchunks = c // cc

    def chunk(cs):
        a_h = jax.nn.sigmoid(
            jnp.dot(wh_ref[pl.ds(cs, cc), :], yh,
                    preferred_element_type=jnp.float32)
            + bh_ref[pl.ds(cs, cc), :])                             # (cc, H)
        a_w = jax.nn.sigmoid(
            jnp.dot(ww_ref[pl.ds(cs, cc), :], yw,
                    preferred_element_type=jnp.float32)
            + bw_ref[pl.ds(cs, cc), :])                             # (cc, W)
        # Expand the small gates to the flat (cc, H*W) layout on the MXU
        # (exact: each output picks exactly one gate value).
        gate = (jnp.dot(a_h, eh_ref[...], preferred_element_type=jnp.float32) *
                jnp.dot(a_w, ew_ref[...], preferred_element_type=jnp.float32))
        xs = x_ref[0, pl.ds(cs, cc), :]                             # native dtype
        o_ref[0, pl.ds(cs, cc), :] = (xs * gate.astype(xs.dtype)).astype(o_ref.dtype)

    if nchunks == 1:
        chunk(0)                                   # fully static slices
    else:
        def body(i, carry):
            chunk(pl.multiple_of(i * cc, cc))
            return carry
        jax.lax.fori_loop(0, nchunks, body, 0, unroll=True)


@jax.jit
def coord_att(x, w1, b1, bn_scale, bn_shift, wh, bh, ww, bw):
    n, c, h, w = x.shape
    mip = w1.shape[0]
    hw = h * w

    # (1) Fold eval-mode BatchNorm into conv1 (trace-time, tiny).
    w1f = (w1 * bn_scale).astype(jnp.float32)                   # (mip, C)
    b1f = (b1 * bn_scale + bn_shift).astype(jnp.float32)        # (mip, 1)

    # (2) Lane-dense layout: flatten spatial dims (free for contiguous NCHW).
    xf = x.reshape(n, c, hw)

    # (3) Constant pooling / expansion matrices (shape-only -> constant-folded).
    rows = jnp.arange(hw, dtype=jnp.int32) // w                 # h index per flat pos
    cols = jnp.arange(hw, dtype=jnp.int32) % w                  # w index per flat pos
    eh = (rows[None, :] == jnp.arange(h, dtype=jnp.int32)[:, None]).astype(jnp.float32)
    ew = (cols[None, :] == jnp.arange(w, dtype=jnp.int32)[:, None]).astype(jnp.float32)
    pool = jnp.concatenate([eh.T / w, ew.T / h], axis=1).astype(x.dtype)   # (HW, H+W)

    # (4) Channel chunk size for the gated apply (bounds VMEM/vreg live ranges).
    cc = c
    if c > 64:
        for cand in (64, 32, 16, 8):
            if c % cand == 0:
                cc = cand
                break

    # (5) Explicit VMEM budget with headroom (double-buffered in/out + consts).
    tile_bytes = c * hw * x.dtype.itemsize
    const_bytes = 4 * (hw * (h + w) + mip * c + mip + 2 * c * mip + 2 * c + (h + w) * hw)
    need = 4 * tile_bytes + 2 * const_bytes + (4 << 20)
    vmem_limit = int(min(max(need, 16 << 20), 64 << 20))

    kernel = functools.partial(_coord_att_kernel, h=h, cc=cc)

    out_flat = pl.pallas_call(
        kernel,
        out_shape=jax.ShapeDtypeStruct((n, c, hw), x.dtype),
        grid=(n,),
        in_specs=[
            pl.BlockSpec((1, c, hw), lambda i: (i, 0, 0)),      # x (lane-dense slab)
            pl.BlockSpec((hw, h + w), lambda i: (0, 0)),        # pooling matrix
            pl.BlockSpec((mip, c), lambda i: (0, 0)),           # w1 (BN folded)
            pl.BlockSpec((mip, 1), lambda i: (0, 0)),           # b1 (BN folded)
            pl.BlockSpec((c, mip), lambda i: (0, 0)),           # wh
            pl.BlockSpec((c, 1), lambda i: (0, 0)),             # bh
            pl.BlockSpec((c, mip), lambda i: (0, 0)),           # ww
            pl.BlockSpec((c, 1), lambda i: (0, 0)),             # bw
            pl.BlockSpec((h, hw), lambda i: (0, 0)),            # eh expansion
            pl.BlockSpec((w, hw), lambda i: (0, 0)),            # ew expansion
        ],
        out_specs=pl.BlockSpec((1, c, hw), lambda i: (i, 0, 0)),
        compiler_params=pltpu.CompilerParams(
            dimension_semantics=("parallel",),
            vmem_limit_bytes=vmem_limit),
    )(xf, pool, w1f, b1f,
      wh.astype(jnp.float32), bh.astype(jnp.float32),
      ww.astype(jnp.float32), bw.astype(jnp.float32),
      eh, ew)

    return out_flat.reshape(n, c, h, w)


def _reference(x, w1, b1, bn_scale, bn_shift, wh, bh, ww, bw):
    """Pure-JAX reference mirroring the PyTorch forward (eval-mode BN)."""
    n, c, h, w = x.shape
    x_h = jnp.mean(x, axis=3)                                  # (N, C, H)
    x_w = jnp.mean(x, axis=2)                                  # (N, C, W)
    y = jnp.concatenate([x_h, x_w], axis=2)                    # (N, C, H+W)
    y = jnp.einsum("mc,ncl->nml", w1, y) + b1[None]            # (N, mip, H+W)
    y = y * bn_scale[None] + bn_shift[None]
    y = y * (jnp.clip(y + 3.0, 0.0, 6.0) / 6.0)                # h_swish
    yh, yw = y[:, :, :h], y[:, :, h:]
    a_h = jax.nn.sigmoid(jnp.einsum("cm,nml->ncl", wh, yh) + bh[None])  # (N,C,H)
    a_w = jax.nn.sigmoid(jnp.einsum("cm,nml->ncl", ww, yw) + bw[None])  # (N,C,W)
    return x * a_w[:, :, None, :] * a_h[:, :, :, None]


if __name__ == "__main__":
    key = jax.random.PRNGKey(0)
    N, C, H, W = 2, 4, 16, 16
    reduction = 32
    mip = max(8, C // reduction)  # = 8
    eps = 1e-5

    ks = jax.random.split(key, 10)
    x = jax.random.normal(ks[0], (N, C, H, W), dtype=jnp.float32)

    # conv1: Conv2d(C, mip, 1)  -> weight (mip, C), bias (mip,)
    w1 = jax.random.normal(ks[1], (mip, C), dtype=jnp.float32) * 0.2
    b1 = jax.random.normal(ks[2], (mip,), dtype=jnp.float32) * 0.1
    # bn1: BatchNorm2d(mip), eval mode (running stats), folded to scale/shift
    gamma = jax.random.uniform(ks[3], (mip,), minval=0.5, maxval=1.5)
    beta = jax.random.normal(ks[4], (mip,)) * 0.1
    run_mean = jax.random.normal(ks[5], (mip,)) * 0.1
    run_var = jax.random.uniform(ks[6], (mip,), minval=0.5, maxval=1.5)
    bn_scale = gamma / jnp.sqrt(run_var + eps)
    bn_shift = beta - run_mean * bn_scale
    # conv_h, conv_w: Conv2d(mip, C, 1) -> weight (C, mip), bias (C,)
    wh = jax.random.normal(ks[7], (C, mip), dtype=jnp.float32) * 0.2
    bh = jax.random.normal(ks[8], (C,), dtype=jnp.float32) * 0.1
    ww = jax.random.normal(ks[9], (C, mip), dtype=jnp.float32) * 0.2
    bw = jnp.linspace(-0.1, 0.1, C, dtype=jnp.float32)

    args = (x, w1,
            b1.reshape(mip, 1), bn_scale.reshape(mip, 1), bn_shift.reshape(mip, 1),
            wh, bh.reshape(C, 1), ww, bw.reshape(C, 1))

    out = jax.block_until_ready(coord_att(*args))
    ref = _reference(*args)

    assert out.shape == (N, C, H, W)
    assert jnp.allclose(out, ref, atol=1e-4, rtol=1e-4), float(
        jnp.max(jnp.abs(out - ref)))

    print("KERNEL_OK")
</pallas_src>

<mosaic_0001>
module attributes {stable_mosaic.version = 11 : i64} {
  func.func @_coord_att_kernel(%arg0: i32, %arg1: memref<1x4x256xf32, #tpu.memory_space<vmem>>, %arg2: memref<256x32xf32, #tpu.memory_space<vmem>>, %arg3: memref<8x4xf32, #tpu.memory_space<vmem>>, %arg4: memref<8x1xf32, #tpu.memory_space<vmem>>, %arg5: memref<4x8xf32, #tpu.memory_space<vmem>>, %arg6: memref<4x1xf32, #tpu.memory_space<vmem>>, %arg7: memref<4x8xf32, #tpu.memory_space<vmem>>, %arg8: memref<4x1xf32, #tpu.memory_space<vmem>>, %arg9: memref<16x256xf32, #tpu.memory_space<vmem>>, %arg10: memref<16x256xf32, #tpu.memory_space<vmem>>, %arg11: memref<1x4x256xf32, #tpu.memory_space<vmem>>) attributes {dimension_semantics = [#tpu.dimension_semantics<parallel>], iteration_bounds = array<i64: 2>, scalar_prefetch = 0 : i64, scratch_operands = 0 : i64, tpu.core_type = #tpu.core_type<tc>, window_params = [{transform_indices = @transform_0, window_bounds = array<i64: 1, 4, 256>}, {pipeline_mode = #tpu.pipeline_mode<synchronous>, transform_indices = @transform_1, window_bounds = array<i64: 256, 32>}, {pipeline_mode = #tpu.pipeline_mode<synchronous>, transform_indices = @transform_2, window_bounds = array<i64: 8, 4>}, {pipeline_mode = #tpu.pipeline_mode<synchronous>, transform_indices = @transform_3, window_bounds = array<i64: 8, 1>}, {pipeline_mode = #tpu.pipeline_mode<synchronous>, transform_indices = @transform_4, window_bounds = array<i64: 4, 8>}, {pipeline_mode = #tpu.pipeline_mode<synchronous>, transform_indices = @transform_5, window_bounds = array<i64: 4, 1>}, {pipeline_mode = #tpu.pipeline_mode<synchronous>, transform_indices = @transform_6, window_bounds = array<i64: 4, 8>}, {pipeline_mode = #tpu.pipeline_mode<synchronous>, transform_indices = @transform_7, window_bounds = array<i64: 4, 1>}, {pipeline_mode = #tpu.pipeline_mode<synchronous>, transform_indices = @transform_8, window_bounds = array<i64: 16, 256>}, {pipeline_mode = #tpu.pipeline_mode<synchronous>, transform_indices = @transform_9, window_bounds = array<i64: 16, 256>}, {transform_indices = @transform_10, window_bounds = array<i64: 1, 4, 256>}]} {
    %c0 = arith.constant 0 : index
    %c0_0 = arith.constant 0 : index
    %c0_1 = arith.constant 0 : index
    %0 = vector.load %arg1[%c0, %c0_0, %c0_1] : memref<1x4x256xf32, #tpu.memory_space<vmem>>, vector<1x4x256xf32>
    %1 = vector.shape_cast %0 : vector<1x4x256xf32> to vector<4x256xf32>
    %c0_2 = arith.constant 0 : index
    %c0_3 = arith.constant 0 : index
    %2 = vector.load %arg2[%c0_2, %c0_3] : memref<256x32xf32, #tpu.memory_space<vmem>>, vector<256x32xf32>
    %cst = arith.constant dense<0.000000e+00> : vector<4x32xf32>
    %3 = tpu.matmul %1, %2, %cst {dimension_numbers = #tpu.dot_dimension_numbers<[1], [0], [0], [1], [0, 0, 1, 1], [], []>} : vector<4x256xf32>, vector<256x32xf32>, vector<4x32xf32> -> vector<4x32xf32>
    %c0_4 = arith.constant 0 : index
    %c0_5 = arith.constant 0 : index
    %4 = vector.load %arg3[%c0_4, %c0_5] : memref<8x4xf32, #tpu.memory_space<vmem>>, vector<8x4xf32>
    %cst_6 = arith.constant dense<0.000000e+00> : vector<8x32xf32>
    %5 = tpu.matmul %4, %3, %cst_6 {dimension_numbers = #tpu.dot_dimension_numbers<[1], [0], [0], [1], [0, 0, 1, 1], [], []>} : vector<8x4xf32>, vector<4x32xf32>, vector<8x32xf32> -> vector<8x32xf32>
    %c0_7 = arith.constant 0 : index
    %c0_8 = arith.constant 0 : index
    %6 = vector.load %arg4[%c0_7, %c0_8] : memref<8x1xf32, #tpu.memory_space<vmem>>, vector<8x1xf32>
    %7 = vector.broadcast %6 : vector<8x1xf32> to vector<8x32xf32>
    %8 = arith.addf %5, %7 : vector<8x32xf32>
    %cst_9 = arith.constant 3.000000e+00 : f32
    %9 = vector.broadcast %cst_9 : f32 to vector<8x32xf32>
    %10 = arith.addf %8, %9 : vector<8x32xf32>
    %cst_10 = arith.constant 0.000000e+00 : f32
    %cst_11 = arith.constant 6.000000e+00 : f32
    %11 = vector.broadcast %cst_10 : f32 to vector<8x32xf32>
    %12 = arith.maximumf %11, %10 : vector<8x32xf32>
    %13 = vector.broadcast %cst_11 : f32 to vector<8x32xf32>
    %14 = arith.minimumf %13, %12 : vector<8x32xf32>
    %cst_12 = arith.constant 0.166666672 : f32
    %15 = vector.broadcast %cst_12 : f32 to vector<8x32xf32>
    %16 = arith.mulf %14, %15 : vector<8x32xf32>
    %17 = arith.mulf %8, %16 : vector<8x32xf32>
    %18 = vector.extract_strided_slice %17 {offsets = [0, 0], sizes = [8, 16], strides = [1, 1]} : vector<8x32xf32> to vector<8x16xf32>
    %19 = vector.extract_strided_slice %17 {offsets = [0, 16], sizes = [8, 16], strides = [1, 1]} : vector<8x32xf32> to vector<8x16xf32>
    %c0_13 = arith.constant 0 : index
    %c0_14 = arith.constant 0 : index
    %20 = vector.load %arg5[%c0_13, %c0_14] : memref<4x8xf32, #tpu.memory_space<vmem>>, vector<4x8xf32>
    %cst_15 = arith.constant dense<0.000000e+00> : vector<4x16xf32>
    %21 = tpu.matmul %20, %18, %cst_15 {dimension_numbers = #tpu.dot_dimension_numbers<[1], [0], [0], [1], [0, 0, 1, 1], [], []>} : vector<4x8xf32>, vector<8x16xf32>, vector<4x16xf32> -> vector<4x16xf32>
    %c0_16 = arith.constant 0 : index
    %c0_17 = arith.constant 0 : index
    %22 = vector.load %arg6[%c0_16, %c0_17] : memref<4x1xf32, #tpu.memory_space<vmem>>, vector<4x1xf32>
    %23 = vector.broadcast %22 : vector<4x1xf32> to vector<4x16xf32>
    %24 = arith.addf %21, %23 : vector<4x16xf32>
    %25 = arith.negf %24 : vector<4x16xf32>
    %26 = math.exp %25 : vector<4x16xf32>
    %cst_18 = arith.constant 1.000000e+00 : f32
    %27 = vector.broadcast %cst_18 : f32 to vector<4x16xf32>
    %28 = arith.addf %27, %26 : vector<4x16xf32>
    %29 = arith.divf %27, %28 : vector<4x16xf32>
    %c0_19 = arith.constant 0 : index
    %c0_20 = arith.constant 0 : index
    %30 = vector.load %arg7[%c0_19, %c0_20] : memref<4x8xf32, #tpu.memory_space<vmem>>, vector<4x8xf32>
    %cst_21 = arith.constant dense<0.000000e+00> : vector<4x16xf32>
    %31 = tpu.matmul %30, %19, %cst_21 {dimension_numbers = #tpu.dot_dimension_numbers<[1], [0], [0], [1], [0, 0, 1, 1], [], []>} : vector<4x8xf32>, vector<8x16xf32>, vector<4x16xf32> -> vector<4x16xf32>
    %c0_22 = arith.constant 0 : index
    %c0_23 = arith.constant 0 : index
    %32 = vector.load %arg8[%c0_22, %c0_23] : memref<4x1xf32, #tpu.memory_space<vmem>>, vector<4x1xf32>
    %33 = vector.broadcast %32 : vector<4x1xf32> to vector<4x16xf32>
    %34 = arith.addf %31, %33 : vector<4x16xf32>
    %35 = arith.negf %34 : vector<4x16xf32>
    %36 = math.exp %35 : vector<4x16xf32>
    %cst_24 = arith.constant 1.000000e+00 : f32
    %37 = vector.broadcast %cst_24 : f32 to vector<4x16xf32>
    %38 = arith.addf %37, %36 : vector<4x16xf32>
    %39 = arith.divf %37, %38 : vector<4x16xf32>
    %c0_25 = arith.constant 0 : index
    %c0_26 = arith.constant 0 : index
    %40 = vector.load %arg9[%c0_25, %c0_26] : memref<16x256xf32, #tpu.memory_space<vmem>>, vector<16x256xf32>
    %cst_27 = arith.constant dense<0.000000e+00> : vector<4x256xf32>
    %41 = tpu.matmul %29, %40, %cst_27 {dimension_numbers = #tpu.dot_dimension_numbers<[1], [0], [0], [1], [0, 0, 1, 1], [], []>} : vector<4x16xf32>, vector<16x256xf32>, vector<4x256xf32> -> vector<4x256xf32>
    %c0_28 = arith.constant 0 : index
    %c0_29 = arith.constant 0 : index
    %42 = vector.load %arg10[%c0_28, %c0_29] : memref<16x256xf32, #tpu.memory_space<vmem>>, vector<16x256xf32>
    %cst_30 = arith.constant dense<0.000000e+00> : vector<4x256xf32>
    %43 = tpu.matmul %39, %42, %cst_30 {dimension_numbers = #tpu.dot_dimension_numbers<[1], [0], [0], [1], [0, 0, 1, 1], [], []>} : vector<4x16xf32>, vector<16x256xf32>, vector<4x256xf32> -> vector<4x256xf32>
    %44 = arith.mulf %41, %43 : vector<4x256xf32>
    %c0_31 = arith.constant 0 : index
    %c0_32 = arith.constant 0 : index
    %c0_33 = arith.constant 0 : index
    %45 = vector.load %arg1[%c0_31, %c0_32, %c0_33] : memref<1x4x256xf32, #tpu.memory_space<vmem>>, vector<1x4x256xf32>
    %46 = vector.shape_cast %45 : vector<1x4x256xf32> to vector<4x256xf32>
    %47 = arith.mulf %46, %44 : vector<4x256xf32>
    %c0_34 = arith.constant 0 : index
    %c0_35 = arith.constant 0 : index
    %c0_36 = arith.constant 0 : index
    %48 = vector.load %arg11[%c0_34, %c0_35, %c0_36] : memref<1x4x256xf32, #tpu.memory_space<vmem>>, vector<1x4x256xf32>
    %49 = vector.shape_cast %48 : vector<1x4x256xf32> to vector<4x256xf32>
    %50 = vector.shape_cast %47 : vector<4x256xf32> to vector<1x4x256xf32>
    tpu.vector_store %arg11[%c0_34, %c0_35, %c0_36], %50 {strides = array<i32>} : memref<1x4x256xf32, #tpu.memory_space<vmem>>, vector<1x4x256xf32>,
    return
  }
  func.func @transform_0(%arg0: i32) -> (i32, i32, i32) {
    %c0_i32 = arith.constant 0 : i32
    %c0_i32_0 = arith.constant 0 : i32
    %c0_i32_1 = arith.constant 0 : i32
    return %arg0, %c0_i32, %c0_i32_0 : i32, i32, i32
  }
  func.func @transform_1(%arg0: i32) -> (i32, i32) {
    %c0_i32 = arith.constant 0 : i32
    %c0_i32_0 = arith.constant 0 : i32
    %c0_i32_1 = arith.constant 0 : i32
    return %c0_i32, %c0_i32_0 : i32, i32
  }
  func.func @transform_2(%arg0: i32) -> (i32, i32) {
    %c0_i32 = arith.constant 0 : i32
    %c0_i32_0 = arith.constant 0 : i32
    %c0_i32_1 = arith.constant 0 : i32
    return %c0_i32, %c0_i32_0 : i32, i32
  }
  func.func @transform_3(%arg0: i32) -> (i32, i32) {
    %c0_i32 = arith.constant 0 : i32
    %c0_i32_0 = arith.constant 0 : i32
    %c0_i32_1 = arith.constant 0 : i32
    return %c0_i32, %c0_i32_0 : i32, i32
  }
  func.func @transform_4(%arg0: i32) -> (i32, i32) {
    %c0_i32 = arith.constant 0 : i32
    %c0_i32_0 = arith.constant 0 : i32
    %c0_i32_1 = arith.constant 0 : i32
    return %c0_i32, %c0_i32_0 : i32, i32
  }
  func.func @transform_5(%arg0: i32) -> (i32, i32) {
    %c0_i32 = arith.constant 0 : i32
    %c0_i32_0 = arith.constant 0 : i32
    %c0_i32_1 = arith.constant 0 : i32
    return %c0_i32, %c0_i32_0 : i32, i32
  }
  func.func @transform_6(%arg0: i32) -> (i32, i32) {
    %c0_i32 = arith.constant 0 : i32
    %c0_i32_0 = arith.constant 0 : i32
    %c0_i32_1 = arith.constant 0 : i32
    return %c0_i32, %c0_i32_0 : i32, i32
  }
  func.func @transform_7(%arg0: i32) -> (i32, i32) {
    %c0_i32 = arith.constant 0 : i32
    %c0_i32_0 = arith.constant 0 : i32
    %c0_i32_1 = arith.constant 0 : i32
    return %c0_i32, %c0_i32_0 : i32, i32
  }
  func.func @transform_8(%arg0: i32) -> (i32, i32) {
    %c0_i32 = arith.constant 0 : i32
    %c0_i32_0 = arith.constant 0 : i32
    %c0_i32_1 = arith.constant 0 : i32
    return %c0_i32, %c0_i32_0 : i32, i32
  }
  func.func @transform_9(%arg0: i32) -> (i32, i32) {
    %c0_i32 = arith.constant 0 : i32
    %c0_i32_0 = arith.constant 0 : i32
    %c0_i32_1 = arith.constant 0 : i32
    return %c0_i32, %c0_i32_0 : i32, i32
  }
  func.func @transform_10(%arg0: i32) -> (i32, i32, i32) {
    %c0_i32 = arith.constant 0 : i32
    %c0_i32_0 = arith.constant 0 : i32
    %c0_i32_1 = arith.constant 0 : i32
    return %arg0, %c0_i32, %c0_i32_0 : i32, i32, i32
  }
}

</mosaic_0001>

<bundles_post_ra>
// kernel: coord_att.1
= control target key start
LH: loop header
LB: loop body
LE: loop exit
PB: predicated region body
PF: predicated region fallthrough
CT: control target
= control target key end

     0   :  { %s1160_s13 = smov 0   ;;  %s1341_s0 = inlined_call_operand.vmem [shape: f32[2,4,256], index: 0, kind: input, shape index: {}]   ;;  %s1342_s1 = inlined_call_operand.vmem [shape: f32[256,32], index: 1, kind: input, shape index: {}]   ;;  %s1343_s2 = inlined_call_operand.vmem [shape: f32[8,4], index: 2, kind: input, shape index: {}]   ;;  %s1344_s3 = inlined_call_operand.vmem [shape: f32[8,1], index: 3, kind: input, shape index: {}]   ;;  %s1345_s4 = inlined_call_operand.vmem [shape: f32[4,8], index: 4, kind: input, shape index: {}]   ;;  %s1346_s5 = inlined_call_operand.vmem [shape: f32[4,1], index: 5, kind: input, shape index: {}]   ;;  %s1347_s6 = inlined_call_operand.vmem [shape: f32[4,8], index: 6, kind: input, shape index: {}]   ;;  %s1348_s7 = inlined_call_operand.vmem [shape: f32[4,1], index: 7, kind: input, shape index: {}]   ;;  %s1349_s8 = inlined_call_operand.vmem [shape: f32[16,256], index: 8, kind: input, shape index: {}]   ;;  %s1350_s9 = inlined_call_operand.vmem [shape: f32[16,256], index: 9, kind: input, shape index: {}]   ;;  %s1351_s10 = inlined_call_operand.vmem [shape: f32[2,4,256], index: 10, kind: output, shape index: {}]  }
   0x1 LB: > { %s953_s14 = sadd.s32 4294967295, %s1099_s13   ;;  %p957_p0 = scmp.ge.s32.totalorder %s1099_s13, 1  ;;  %s1099_s13 = sphi %s1160_s13, %s20_s13  }
   0x2   : > { %p312_p1 = scmp.lt.s32.totalorder %s1099_s13, 3 }
   0x4   : > { %p313_p2 = pnand %p957_p0, %p312_p1 }
   0x5   : > { %v377_v0 = vld [vmem:[%s1342_s1 + $0x80] sm:$0xff] (!%p313_p2)  ;;  %v378_v1 = vld [vmem:[%s1342_s1 + $0x88] sm:$0xff] (!%p313_p2)  ;;  %p350_p3 = scmp.lt.s32.totalorder (!%p313_p2), %s953_s14, 1  ;;  %v379_v5 = vld [vmem:[%s1342_s1 + $0x90] sm:$0xff] (!%p313_p2)  ;;  %v1101_v50 = vmov (!%p313_p2), 0.0   ;;  %vm1102_vm0 = vmmov (!%p313_p2), 0  }
   0x6   : > { %316 = sbr.rel (%p313_p2) target bundleno = 1056 (0x420), region = 60  ;;  %v361_v2 = vld [vmem:[%s1342_s1] sm:$0xff] (!%p313_p2)  ;;  %v1030_v3 = vpack.c.bf16 (!%p313_p2), %v378_v1, %v377_v0  ;;  %v362_v4 = vld [vmem:[%s1342_s1 + $0x8] sm:$0xff] (!%p313_p2)  ;;  %v380_v6 = vld [vmem:[%s1342_s1 + $0x98] sm:$0xff] (!%p313_p2)  ;;  %1015 = vmatprep.subr.mxu1 (!%p313_p2), %v1101_v50  ;;  %1017 = vmatprep.mubr.msk.f32.mxu1 (!%p313_p2), %vm1102_vm0, %v1101_v50  ;;  %v1103_v52 = vmov (!%p313_p2), 0   ;;  %vm477_vm1 = vcmask (!%p313_p2), 1043456  }
   0x7   : > { %v1032_v7 = vpack.c.bf16 (!%p313_p2), %v362_v4, %v361_v2  ;;  %v1034_v8 = vpack.c.bf16 (!%p313_p2), %v380_v6, %v379_v5  ;;  %v363_v9 = vld [vmem:[%s1342_s1 + $0x10] sm:$0xff] (!%p313_p2)  ;;  %v364_v10 = vld [vmem:[%s1342_s1 + $0x18] sm:$0xff] (!%p313_p2)  ;;  %v381_v11 = vld [vmem:[%s1342_s1 + $0xa0] sm:$0xff] (!%p313_p2)  ;;  %1082 = vset.pattern.permute.xlu0 (!%p313_p2), %v1103_v52  ;;  %1083 = vset.pattern.permute.xlu1 (!%p313_p2), %v1103_v52  ;;  %vm473_vm2 = vcmask (!%p313_p2), 31744   ;;  %vm563_vm3 = vcmask (!%p313_p2), 64512   ;;  %s1104_s24 = smov (!%p313_p2), 112  }
   0x8   : > { %1031 = vmatprep.subr.bf16.mxu0 (!%p313_p2), %v1030_v3  ;;  %v382_v12 = vld [vmem:[%s1342_s1 + $0xa8] sm:$0xff] (!%p313_p2)  ;;  %v1036_v13 = vpack.c.bf16 (!%p313_p2), %v364_v10, %v363_v9  ;;  %v365_v15 = vld [vmem:[%s1342_s1 + $0x20] sm:$0xff] (!%p313_p2)  ;;  %v383_v17 = vld [vmem:[%s1342_s1 + $0xb0] sm:$0xff] (!%p313_p2)  ;;  %vm737_vm4 = vcmask (!%p313_p2), 130048  }
   0x9   : > { %1033 = vmatpush3.bf16.msra.mxu0 (!%p313_p2), %v1032_v7  ;;  %v1038_v14 = vpack.c.bf16 (!%p313_p2), %v382_v12, %v381_v11  ;;  %v366_v16 = vld [vmem:[%s1342_s1 + $0x28] sm:$0xff] (!%p313_p2)  ;;  %v384_v18 = vld [vmem:[%s1342_s1 + $0xb8] sm:$0xff] (!%p313_p2)  ;;  %v367_v21 = vld [vmem:[%s1342_s1 + $0x30] sm:$0xff] (!%p313_p2) }
   0xa   : > { %1035 = vmatprep.subr.bf16.mxu0 (!%p313_p2), %v1034_v8  ;;  %v1040_v19 = vpack.c.bf16 (!%p313_p2), %v366_v16, %v365_v15  ;;  %v1042_v20 = vpack.c.bf16 (!%p313_p2), %v384_v18, %v383_v17  ;;  %v368_v22 = vld [vmem:[%s1342_s1 + $0x38] sm:$0xff] (!%p313_p2)  ;;  %v385_v23 = vld [vmem:[%s1342_s1 + $0xc0] sm:$0xff] (!%p313_p2)  ;;  %v386_v24 = vld [vmem:[%s1342_s1 + $0xc8] sm:$0xff] (!%p313_p2) }
   0xb   : > { %v1044_v27 = vpack.c.bf16 (!%p313_p2), %v368_v22, %v367_v21  ;;  %v1046_v28 = vpack.c.bf16 (!%p313_p2), %v386_v24, %v385_v23  ;;  %v369_v29 = vld [vmem:[%s1342_s1 + $0x40] sm:$0xff] (!%p313_p2)  ;;  %v370_v30 = vld [vmem:[%s1342_s1 + $0x48] sm:$0xff] (!%p313_p2)  ;;  %v387_v31 = vld [vmem:[%s1342_s1 + $0xd0] sm:$0xff] (!%p313_p2) }
   0xc   : > { %v388_v32 = vld [vmem:[%s1342_s1 + $0xd8] sm:$0xff] (!%p313_p2)  ;;  %v1048_v33 = vpack.c.bf16 (!%p313_p2), %v370_v30, %v369_v29  ;;  %v371_v35 = vld [vmem:[%s1342_s1 + $0x50] sm:$0xff] (!%p313_p2)  ;;  %v389_v37 = vld [vmem:[%s1342_s1 + $0xe0] sm:$0xff] (!%p313_p2) }
   0xd   : > { %s1353_s14 = smov (!%p350_p3, %s953_s14), 1  ;;  %1037 = vmatpush3.bf16.msra.mxu0 %v1036_v13  ;;  %v1050_v34 = vpack.c.bf16 %v388_v32, %v387_v31  ;;  %v372_v36 = vld [vmem:[%s1342_s1 + $0x58] sm:$0xff]  ;;  %v390_v38 = vld [vmem:[%s1342_s1 + $0xe8] sm:$0xff]  ;;  %v373_v41 = vld [vmem:[%s1342_s1 + $0x60] sm:$0xff] }
   0xe   : > { %s972_s17 = sshll.u32 %s1353_s14, 3  ;;  %1039 = vmatprep.subr.bf16.mxu0 %v1038_v14  ;;  %v1052_v39 = vpack.c.bf16 %v372_v36, %v371_v35  ;;  %v1054_v40 = vpack.c.bf16 %v390_v38, %v389_v37  ;;  %v374_v42 = vld [vmem:[%s1342_s1 + $0x68] sm:$0xff]  ;;  %v391_v43 = vld [vmem:[%s1342_s1 + $0xf0] sm:$0xff]  ;;  %v392_v44 = vld [vmem:[%s1342_s1 + $0xf8] sm:$0xff] }
   0xf   : > { %s354_s28 = scalar_lea.vmem %s1341_s0, %s972_s17  ;;  %v1056_v45 = vpack.c.bf16 %v374_v42, %v373_v41  ;;  %v1058_v46 = vpack.c.bf16 %v392_v44, %v391_v43  ;;  %v375_v47 = vld [vmem:[%s1342_s1 + $0x70] sm:$0xff]  ;;  %v376_v48 = vld [vmem:[%s1342_s1 + $0x78] sm:$0xff]  ;;  %v467_v51 = vld [vmem:[%s1344_s3] sm:$0xff] }
  0x10   : > { %v1230_v25 = vld [vmem:[%s354_s28] sm:$0xff]  ;;  %v1060_v49 = vpack.c.bf16 %v376_v48, %v375_v47  ;;  %470 = vperm.xlu0 %1082, %v467_v51   ;;  %v734_v12 = vld [vmem:[%s1349_s8 + $0x8] sm:$0xff]  ;;  %v736_v13 = vld [vmem:[%s1349_s8 + $0x18] sm:$0xff]  ;;  %s359_s28 = scalar_lea.vmem %s1351_s10, %s972_s17 }
  0x11   : > { %v394_v26 = vcombine.high %v1230_v25, %v1230_v25  ;;  %1041 = vmatpush3.bf16.msra.mxu0 %v1040_v19  ;;  %v466_v56 = vld [vmem:[%s1343_s2] sm:$0xff]  ;;  %v1062_v14 = vpack.c.bf16 %v736_v13, %v734_v12  ;;  %v735_v16 = vld [vmem:[%s1349_s8 + $0x10] sm:$0xff]  ;;  %v813_v17 = vld [vmem:[%s1350_s9 + $0x8] sm:$0xff] }
  0x12   : > { %1043 = vmatprep.subr.bf16.mxu0 %v1042_v20  ;;  %v557_v61 = vld [vmem:[%s1346_s5] sm:$0xf]  ;;  %v815_v19 = vld [vmem:[%s1350_s9 + $0x18] sm:$0xff]  ;;  %v814_v24 = vld [vmem:[%s1350_s9 + $0x10] sm:$0xff] }
  0x13   : > { %460 = vmatprep.mubr.f32.mxu0 %v394_v26  ;;  %560 = vperm.xlu1 %1083, %v557_v61   ;;  %v644_v63 = vld [vmem:[%s1348_s7] sm:$0xf]  ;;  %v1066_v20 = vpack.c.bf16 %v815_v19, %v813_v17 }
  0x14   : > { %v556_v4 = vld [vmem:[%s1345_s4] sm:$0xf] }
  0x15   : > { %1045 = vmatpush3.bf16.msra.mxu0 %v1044_v27  ;;  %v643_v5 = vld [vmem:[%s1347_s6] sm:$0xf] }
  0x16   : > { %1047 = vmatprep.subr.bf16.mxu0 %v1046_v28  ;;  %v733_v15 = vld [vmem:[%s1349_s8] sm:$0xff] }
  0x17   : > { %647 = vperm.xlu1 %1083, %v644_v63   ;;  %v1064_v18 = vpack.c.bf16 %v735_v16, %v733_v15  ;;  %v812_v23 = vld [vmem:[%s1350_s9] sm:$0xff] }
  0x18   : > { %v1068_v26 = vpack.c.bf16 %v814_v24, %v812_v23 }
  0x19   : > { %1049 = vmatpush3.bf16.msra.mxu0 %v1048_v33 }
  0x1a   : > { %1051 = vmatprep.subr.bf16.mxu0 %v1050_v34 }
  0x1d   : > { %1053 = vmatpush3.bf16.msra.mxu0 %v1052_v39 }
  0x1e   : > { %1055 = vmatprep.subr.bf16.mxu0 %v1054_v40 }
  0x21   : > { %1057 = vmatpush3.bf16.msra.mxu0 %v1056_v45 }
  0x22   : > { %1059 = vmatprep.subr.bf16.mxu0 %v1058_v46 }
  0x25   : > { %1061 = vmatpush3.bf16.msra.mxu0 %v1060_v49 }
  0x28   : > { %461 = vmatmul.mubr.f32.vlgmr.msra.gmra.mrb[0].mxu0 %v1230_v25 }
  0x8f   : > { %v471_v57 = vpop.permute.xlu0 %470 }
  0x92   : > { %v561_v7 = vpop.permute.xlu1 %560 }
  0x96   : > { %v648_v28 = vpop.permute.xlu1 %647 }
  0xfb   : > { %v1006_v53 = vpop.f32.mrb[0].mxu0 }
  0xfc   : > { %v1007_v54 = vpop.f32.mrb[1].mxu0 }
  0xfd   : > { %v1008_v55 = vadd.f32 %v1007_v54, %v1006_v53 }
  0xff   : > { %1016 = vmatpush3.msk.msra.mxu1 %vm477_vm1, %v1008_v55 }
 0x100   : > { %1018 = vmatmul.mubr.msk.f32.vlgmr.msra.gmra.mrb[0].mxu1 %vm473_vm2, %v466_v56  ;;  %1020 = vmatprep.subr.mxu1 %v1101_v50 }
 0x101   : > { %1022 = vmatprep.mubr.msk.f32.mxu1 %vm1102_vm0, %v1101_v50 }
 0x1d3   : > { %v547_v58 = vpop.f32.mrb[0].mxu1 }
 0x1d4   : > { %v548_v59 = vadd.f32 %v547_v58, %v471_v57  ;;  %v1019_v60 = vpop.f32.mrb[1].mxu1 }
 0x1d6   : > { %v551_v62 = vadd.f32 3.0, %v548_v59 }
 0x1d8   : > { %v552_v0 = vmax.f32 %v551_v62, 0.0 }
 0x1da   : > { %v553_v1 = vmin.f32 %v552_v0, 6.0 }
 0x1dc   : > { %v554_v2 = vmul.f32 0.16666667, %v553_v1 }
 0x1de   : > { %v555_v3 = vmul.f32 %v554_v2, %v548_v59 }
 0x1e0   : > { %651 = vrot.lane.b32.xlu0 %v555_v3, %s1104_s24  ;;  %1021 = vmatpush3.msra.mxu1 %v555_v3 }
 0x1e1   : > { %1023 = vmatmul.mubr.msk.f32.vlgmr.msra.gmra.mrb[2].mxu1 %vm563_vm3, %v556_v4  ;;  %1025 = vmatprep.subr.mxu1 %v1101_v50 }
 0x1e2   : > { %1027 = vmatprep.mubr.msk.f32.mxu1 %vm1102_vm0, %v1101_v50 }
 0x252   : > { %v652_v6 = vpop.permute.xlu0 %651 }
 0x253   : > { %1026 = vmatpush3.msra.mxu1 %v652_v6 }
 0x254   : > { %1028 = vmatmul.mubr.msk.f32.vlgmr.msra.gmra.mrb[4].mxu1 %vm563_vm3, %v643_v5  ;;  %1063 = vmatprep.subr.bf16.mxu1 %v1062_v14 }
 0x255   : > { %805 = vmatprep.mubr.f32.mxu1 %v1101_v50  ;;  %1065 = vmatpush1.bf16.msra.mxu1 %v1064_v18 }
 0x256   : > { %1067 = vmatprep.subr.bf16.mxu1 %v1066_v20 }
 0x2b4   : > { %v633_v8 = vpop.f32.mrb[2].mxu1 }
 0x2b5   : > { %v634_v9 = vadd.f32 %v633_v8, %v561_v7  ;;  %v1024_v10 = vpop.f32.mrb[3].mxu1 }
 0x2b7   : > { %v965_v11 = vmul.f32 -1.442695, %v634_v9 }
 0x2b9   : > { %1085 = vpow2.f32 %v965_v11 }
 0x2c3   : > { %v1086_v21 = vpop.eup %1085 }
 0x2c4   : > { %v640_v22 = vadd.f32 1.0, %v1086_v21 }
 0x2c6   : > { %1087 = vrcp.f32 %v640_v22 }
 0x2d0   : > { %v1088_v27 = vpop.eup %1087 }
 0x2d1   : > { %968 = vmatmul.mubr.msk.f32.vlgmr.msra.gmra.mrb[6].mxu1 %vm737_vm4, %v1088_v27 }
 0x2d2   : > { %1069 = vmatpush1.bf16.msra.mxu1 %v1068_v26  ;;  %883 = vmatprep.mubr.f32.mxu1 %v1101_v50 }
 0x327   : > { %v723_v29 = vpop.f32.mrb[4].mxu1 }
 0x328   : > { %v724_v30 = vadd.f32 %v723_v29, %v648_v28  ;;  %v1029_v31 = vpop.f32.mrb[5].mxu1 }
 0x32a   : > { %v967_v32 = vmul.f32 -1.442695, %v724_v30 }
 0x32c   : > { %1089 = vpow2.f32 %v967_v32 }
 0x336   : > { %v1090_v33 = vpop.eup %1089 }
 0x337   : > { %v730_v34 = vadd.f32 1.0, %v1090_v33 }
 0x339   : > { %1091 = vrcp.f32 %v730_v34 }
 0x343   : > { %v1092_v35 = vpop.eup %1091 }
 0x344   : > { %969 = vmatmul.mubr.msk.f32.vlgmr.msra.gmra.mrb[8].mxu1 %vm737_vm4, %v1092_v35 }
 0x3a4   : > { %v807_v36 = vpop.f32.mrb[6].mxu1 }
 0x3a5   : > { %v809_v37 = vpop.f32.mrb[7].mxu1 }
 0x417   : > { %v885_v38 = vpop.f32.mrb[8].mxu1 }
 0x418   : > { %v890_v39 = vmul.f32 %v885_v38, %v807_v36  ;;  %v887_v40 = vpop.f32.mrb[9].mxu1 }
 0x419   : > { %v891_v41 = vmul.f32 %v887_v40, %v809_v37 }
 0x41b   : > { %v894_v42 = vcombine.low %v890_v39, %v891_v41 }
 0x41d   : > { %v896_v43 = vmul.f32 %v894_v42, %v1230_v25 }
 0x41f   : > { %897 = vst [vmem:[%s359_s28] sm:$0xff] %v896_v43 }
 0x420 PF: > { %s20_s13 = sadd.s32 1, %s1099_s13  }
 0x421   : > { %p17_p4 = scmp.ge.s32.totalorder %s20_s13, 4  }
 0x423   :  { %19 = sbr.rel (!%p17_p4) target bundleno = 1 (0x1), region = 90 }

</bundles_post_ra>
